<compile_context>
chip_gen: v7x
topology: tpu7x:2x2x1
jax: 0.10.0
libtpu: 0.0.40
codegen_flags: <defaults>
</compile_context>

<pallas_src>
import functools
import math
from typing import Dict, List

import jax
import jax.numpy as jnp
from jax import lax
from jax.experimental import pallas as pl
from jax.experimental.pallas import tpu as pltpu


def _round_up(x: int, m: int) -> int:
    return ((x + m - 1) // m) * m


def _cdiv(a: int, b: int) -> int:
    return -(-a // b)


# --------------------------------------------------------------------------
# Pallas kernel: all modality heads fused; one row-tile per grid step.
#   refs = (x_0..x_{nm-1},          (tm, d_m)     unpadded inputs (any float dtype)
#           w1_0..w1_{nm-1},        (d_m, H)      layer-1 weights, block-diag columns
#           b1, segmat, inv_w,      (1,H) (H,H) (1,H)
#           w2, b2,                 (H, O) (1, O) layer-2 (gamma folded in), packed cols
#           o_ref)                  (tm, O)       lane-dense packed output
# --------------------------------------------------------------------------
def _fused_heads_kernel(*refs, nm, eps, compute_dtype):
    x_refs = refs[:nm]
    w1_refs = refs[nm:2 * nm]
    b1_ref, segmat_ref, invw_ref, w2_ref, b2_ref, o_ref = refs[2 * nm:]

    # ---- Layer 1: per-modality matmuls summed into one packed 128-lane hidden.
    # Each w1_m only populates its own hidden column slice, so the sum packs all
    # modalities block-diagonally.  (MXU, f32 accumulation.)
    h = jnp.dot(x_refs[0][...].astype(compute_dtype), w1_refs[0][...],
                preferred_element_type=jnp.float32)
    for m in range(1, nm):
        h = h + jnp.dot(x_refs[m][...].astype(compute_dtype), w1_refs[m][...],
                        preferred_element_type=jnp.float32)
    h = jnp.maximum(h + b1_ref[...], 0.0)          # bias + ReLU; padded lanes stay 0

    # ---- Segmented LayerNorm, two-pass, f32 stats.
    # segmat[i,j] = 1 iff hidden lanes i,j belong to the same modality (0 on
    # padded lanes); inv_w[j] = 1/width(segment(j)) (0 on padded lanes).
    # h @ segmat broadcasts each segment's sum to its own lanes, so the whole
    # LayerNorm is one pass over the 128-wide slab instead of one LN per head.
    segmat = segmat_ref[...]
    invw = invw_ref[...]
    mean = jnp.dot(h, segmat, preferred_element_type=jnp.float32) * invw
    centered = h - mean
    var = jnp.dot(centered * centered, segmat,
                  preferred_element_type=jnp.float32) * invw
    hn = centered * lax.rsqrt(var + eps)
    # Dropout is identity in eval mode; gamma/beta are folded into w2/b2.

    # ---- Layer 2: one block-diagonal matmul packs every head into its own
    # out_dim-wide output column slice -> lane-dense (tm, 128) unmasked store.
    out = jnp.dot(hn.astype(compute_dtype), w2_ref[...],
                  preferred_element_type=jnp.float32) + b2_ref[...]
    o_ref[...] = out.astype(o_ref.dtype)


def fused_mlp_heads_pallas(xs, fused, *, rows, tm, out_dtype, eps=1e-12):
    """xs: list of (rows, d_m) arrays (unpadded, any float dtype)."""
    nm = len(xs)
    o_pad = fused["w2"].shape[1]
    grid = (_cdiv(rows, tm),)

    x_specs = [pl.BlockSpec((tm, x.shape[1]), lambda i: (i, 0)) for x in xs]
    const = lambda a: pl.BlockSpec(a.shape, lambda i: (0, 0))
    in_specs = (x_specs
                + [const(w) for w in fused["w1"]]
                + [const(fused["b1"]), const(fused["segmat"]),
                   const(fused["inv_w"]), const(fused["w2"]), const(fused["b2"])])

    kernel = functools.partial(_fused_heads_kernel, nm=nm, eps=eps,
                               compute_dtype=fused["compute_dtype"])

    return pl.pallas_call(
        kernel,
        out_shape=jax.ShapeDtypeStruct((rows, o_pad), out_dtype),
        grid_spec=pltpu.PrefetchScalarGridSpec(
            num_scalar_prefetch=0,
            grid=grid,
            in_specs=in_specs,
            out_specs=pl.BlockSpec((tm, o_pad), lambda i: (i, 0)),
        ),
        compiler_params=pltpu.CompilerParams(
            dimension_semantics=("parallel",)),
    )(*xs, *fused["w1"], fused["b1"], fused["segmat"], fused["inv_w"],
      fused["w2"], fused["b2"])


# --------------------------------------------------------------------------
# Parameter init (PyTorch get_mlp_head shapes) and fused packing
# --------------------------------------------------------------------------
def init_mlp_head_params(key, in_dim, hidden_dim, out_dim):
    """Matches get_mlp_head(in, hid, out): hidden//2 bottleneck."""
    h = hidden_dim // 2
    k1, k2, k3, k4, k5, k6 = jax.random.split(key, 6)
    return {
        "w1": (jax.random.normal(k1, (in_dim, h), jnp.float32)
               / jnp.sqrt(jnp.float32(in_dim))),
        "b1": jax.random.normal(k2, (h,), jnp.float32) * 0.01,
        # PyTorch inits gamma=1, beta=0; perturb here so the gamma/beta -> w2/b2
        # fold is genuinely exercised by the correctness check.
        "gamma": 1.0 + 0.1 * jax.random.normal(k5, (h,), jnp.float32),
        "beta": 0.02 * jax.random.normal(k6, (h,), jnp.float32),
        "w2": (jax.random.normal(k3, (h, out_dim), jnp.float32)
               / jnp.sqrt(jnp.float32(h))),
        "b2": jax.random.normal(k4, (out_dim,), jnp.float32) * 0.01,
    }


def pack_fused_params(params: Dict[str, dict], modalities: List[str],
                      out_dim: int, compute_dtype) -> dict:
    """Block-diagonal packing: every modality gets its own hidden-lane segment in
    one 128-lane slab and its own output column slice; LN affine is folded into
    layer 2 (correct because w2's padded rows are exact zeros by construction)."""
    nm = len(modalities)
    hidden = [params[m]["w1"].shape[1] for m in modalities]
    h_pad = _round_up(sum(hidden), 128)
    o_pad = _round_up(nm * out_dim, 128)

    w1_list = []
    b1 = jnp.zeros((1, h_pad), jnp.float32)
    w2 = jnp.zeros((h_pad, o_pad), jnp.float32)        # padded rows stay exactly 0
    b2 = jnp.zeros((1, o_pad), jnp.float32)
    seg_id = -jnp.ones((h_pad,), jnp.int32)            # -1 marks padded lanes
    inv_w = jnp.zeros((1, h_pad), jnp.float32)

    off = 0
    for m, mod in enumerate(modalities):
        p = params[mod]
        d_in, h = p["w1"].shape
        c0, c1 = m * out_dim, (m + 1) * out_dim
        # layer-1 weights: columns placed in this modality's hidden segment
        w1_m = jnp.zeros((d_in, h_pad), jnp.float32).at[:, off:off + h].set(p["w1"])
        w1_list.append(w1_m.astype(compute_dtype))
        b1 = b1.at[0, off:off + h].set(p["b1"])
        # Fold LayerNorm affine into layer 2:
        #   (hn*g + bt) @ w2 + b2 == hn @ (g[:,None]*w2) + (b2 + bt @ w2)
        w2 = w2.at[off:off + h, c0:c1].set(p["gamma"][:, None] * p["w2"])
        b2 = b2.at[0, c0:c1].set(p["b2"] + p["beta"] @ p["w2"])
        seg_id = seg_id.at[off:off + h].set(m)
        inv_w = inv_w.at[0, off:off + h].set(1.0 / float(h))
        off += h

    same = (seg_id[:, None] == seg_id[None, :]) & (seg_id[:, None] >= 0)
    return {
        "w1": tuple(w1_list),
        "b1": b1,
        "segmat": same.astype(jnp.float32),   # f32: LN stats stay full precision
        "inv_w": inv_w,
        "w2": w2.astype(compute_dtype),
        "b2": b2,
        "compute_dtype": compute_dtype,
        "h_pad": h_pad,
        "o_pad": o_pad,
    }


# --------------------------------------------------------------------------
# ObjectLevelEncoder wrapper
# --------------------------------------------------------------------------
class ObjectLevelEncoderPallas:
    # ModalityType.* keys
    POINT, CAD, RGB, REF = "point", "cad", "rgb", "referral"

    def __init__(self, feat_dims: Dict[str, int], out_dim: int,
                 modalities: List[str], key, *, use_bf16: bool = True,
                 out_dtype=jnp.float32, row_tile: int = 512,
                 min_pallas_rows: int = 0, eps: float = 1e-12):
        self.modalities = list(modalities)
        self.out_dim = out_dim
        self.out_dtype = out_dtype
        self.row_tile = row_tile
        # Below this many object rows the Pallas launch/pipeline overhead can't
        # win; plain XLA is used instead (set to ~256 in production).
        self.min_pallas_rows = min_pallas_rows
        self.eps = eps
        keys = jax.random.split(key, len(self.modalities))
        self.params = {}
        for k, mod in zip(keys, self.modalities):
            d = feat_dims[mod]
            self.params[mod] = init_mlp_head_params(k, d, d, out_dim)
        compute_dtype = jnp.bfloat16 if use_bf16 else jnp.float32
        self.fused = pack_fused_params(self.params, self.modalities, out_dim,
                                       compute_dtype)

    def _pick_row_tile(self, rows: int) -> int:
        if rows < 8:
            return rows                       # block dim == full array dim is legal
        tm = max(8, min(self.row_tile, (rows // 8) * 8))
        # v7x has 2 TensorCores; give the "parallel" grid axis >= 2 steps for
        # non-tiny inputs so both cores get work.  Irrelevant on v5e/v6e.
        if rows > 256 and _cdiv(rows, tm) < 2:
            tm = max(8, _round_up(_cdiv(rows, 2), 8))
        return tm

    def forward(self, data_dict):
        xs = []
        for mod in self.modalities:
            x = data_dict["inputs"][mod]
            if not jnp.issubdtype(x.dtype, jnp.floating):
                x = x.astype(jnp.float32)     # `.float()` for non-float inputs;
            xs.append(x)                      # bf16/f32 go through unchanged.
        lead = xs[0].shape[:-1]
        # All modalities describe the same (batch, num_objects) objects.
        assert all(x.shape[:-1] == lead for x in xs), "leading shapes must match"
        rows = int(math.prod(lead)) if lead else 1
        xs2d = [x.reshape(rows, x.shape[-1]) for x in xs]   # views, no extra HBM pass

        data_dict["embeddings"] = {}

        if rows < self.min_pallas_rows:       # small-M fast path (pure XLA)
            for mod, x in zip(self.modalities, xs2d):
                y = mlp_head_ref(x.astype(jnp.float32), self.params[mod], eps=self.eps)
                data_dict["embeddings"][mod] = (
                    y.astype(self.out_dtype).reshape(*lead, self.out_dim))
            return data_dict

        tm = self._pick_row_tile(rows)
        packed = fused_mlp_heads_pallas(xs2d, self.fused, rows=rows, tm=tm,
                                        out_dtype=self.out_dtype, eps=self.eps)
        for m, mod in enumerate(self.modalities):
            y = packed[:, m * self.out_dim:(m + 1) * self.out_dim]
            data_dict["embeddings"][mod] = y.reshape(*lead, self.out_dim)
        return data_dict


# --------------------------------------------------------------------------
# Pure-JAX reference (mirrors the PyTorch head, f32, two-pass LayerNorm)
# --------------------------------------------------------------------------
def mlp_head_ref(x2d, p, eps=1e-12):
    h = x2d @ p["w1"] + p["b1"]
    h = jnp.maximum(h, 0.0)
    mean = jnp.mean(h, axis=-1, keepdims=True)
    var = jnp.mean((h - mean) ** 2, axis=-1, keepdims=True)
    h = (h - mean) * lax.rsqrt(var + eps) * p["gamma"] + p["beta"]
    return h @ p["w2"] + p["b2"]


if __name__ == "__main__":
    key = jax.random.PRNGKey(0)
    k_model, k_pt, k_rgb, k_cad, k_ref = jax.random.split(key, 5)

    batch, num_obj = 2, 8          # 16 object rows total
    Enc = ObjectLevelEncoderPallas
    feat_dims = {Enc.POINT: 32, Enc.RGB: 64, Enc.CAD: 32, Enc.REF: 48}
    out_dim = 32
    modalities = [Enc.POINT, Enc.RGB, Enc.CAD, Enc.REF]

    inputs_f32 = {
        Enc.POINT: jax.random.normal(k_pt, (batch, num_obj, 32), jnp.float32),
        Enc.RGB: jax.random.normal(k_rgb, (batch, num_obj, 64), jnp.float32),
        Enc.CAD: jax.random.normal(k_cad, (batch, num_obj, 32), jnp.float32),
        Enc.REF: jax.random.normal(k_ref, (batch, num_obj, 48), jnp.float32),
    }
    data_dict = {"inputs": inputs_f32}

    # bf16 matmuls + bf16 packed output (fast MXU path on v5e/v6e/v7x).
    enc_bf16 = Enc(feat_dims, out_dim, modalities, k_model,
                   use_bf16=True, out_dtype=jnp.bfloat16)
    # f32 end-to-end (exact check against the PyTorch-equivalent reference).
    enc_f32 = Enc(feat_dims, out_dim, modalities, k_model,
                  use_bf16=False, out_dtype=jnp.float32)

    out_bf16 = enc_bf16.forward(dict(data_dict))
    out_f32 = enc_f32.forward(dict(data_dict))
    # bf16 inputs (halving x HBM traffic) are accepted by the kernel directly.
    out_bf16_in = enc_bf16.forward(
        {"inputs": {m: v.astype(jnp.bfloat16) for m, v in inputs_f32.items()}})

    for mod in modalities:
        ref = mlp_head_ref(
            inputs_f32[mod].reshape(-1, feat_dims[mod]),
            enc_f32.params[mod]).reshape(batch, num_obj, out_dim)

        e32 = jax.block_until_ready(out_f32["embeddings"][mod])
        e16 = jax.block_until_ready(out_bf16["embeddings"][mod]).astype(jnp.float32)
        e16i = jax.block_until_ready(out_bf16_in["embeddings"][mod]).astype(jnp.float32)
        assert e32.shape == (batch, num_obj, out_dim), e32.shape
        assert e16.shape == (batch, num_obj, out_dim), e16.shape
        assert jnp.allclose(e32, ref, atol=1e-4, rtol=1e-4), f"f32 mismatch: {mod}"
        assert jnp.allclose(e16, ref, atol=7e-2, rtol=7e-2), f"bf16 mismatch: {mod}"
        assert jnp.allclose(e16i, ref, atol=1e-1, rtol=1e-1), f"bf16-input mismatch: {mod}"

    # Exercise the small-M pure-XLA fallback once and check it agrees.
    enc_f32.min_pallas_rows = 10 ** 9
    out_fb = enc_f32.forward(dict(data_dict))
    enc_f32.min_pallas_rows = 0
    for mod in modalities:
        a = jax.block_until_ready(out_fb["embeddings"][mod])
        assert jnp.allclose(a, out_f32["embeddings"][mod], atol=1e-4, rtol=1e-4), (
            f"fallback mismatch: {mod}")

    print("KERNEL_OK")
</pallas_src>

<mosaic_0001>
module attributes {stable_mosaic.version = 11 : i64} {
  func.func @_fused_heads_kernel(%arg0: i32, %arg1: memref<16x32xf32, #tpu.memory_space<vmem>>, %arg2: memref<16x64xf32, #tpu.memory_space<vmem>>, %arg3: memref<16x32xf32, #tpu.memory_space<vmem>>, %arg4: memref<16x48xf32, #tpu.memory_space<vmem>>, %arg5: memref<32x128xbf16, #tpu.memory_space<vmem>>, %arg6: memref<64x128xbf16, #tpu.memory_space<vmem>>, %arg7: memref<32x128xbf16, #tpu.memory_space<vmem>>, %arg8: memref<48x128xbf16, #tpu.memory_space<vmem>>, %arg9: memref<1x128xf32, #tpu.memory_space<vmem>>, %arg10: memref<128x128xf32, #tpu.memory_space<vmem>>, %arg11: memref<1x128xf32, #tpu.memory_space<vmem>>, %arg12: memref<128x128xbf16, #tpu.memory_space<vmem>>, %arg13: memref<1x128xf32, #tpu.memory_space<vmem>>, %arg14: memref<16x128xbf16, #tpu.memory_space<vmem>>) attributes {dimension_semantics = [#tpu.dimension_semantics<parallel>], iteration_bounds = array<i64: 1>, scalar_prefetch = 0 : i64, scratch_operands = 0 : i64, tpu.core_type = #tpu.core_type<tc>, window_params = [{transform_indices = @transform_0, window_bounds = array<i64: 16, 32>}, {transform_indices = @transform_1, window_bounds = array<i64: 16, 64>}, {transform_indices = @transform_2, window_bounds = array<i64: 16, 32>}, {transform_indices = @transform_3, window_bounds = array<i64: 16, 48>}, {pipeline_mode = #tpu.pipeline_mode<synchronous>, transform_indices = @transform_4, window_bounds = array<i64: 32, 128>}, {pipeline_mode = #tpu.pipeline_mode<synchronous>, transform_indices = @transform_5, window_bounds = array<i64: 64, 128>}, {pipeline_mode = #tpu.pipeline_mode<synchronous>, transform_indices = @transform_6, window_bounds = array<i64: 32, 128>}, {pipeline_mode = #tpu.pipeline_mode<synchronous>, transform_indices = @transform_7, window_bounds = array<i64: 48, 128>}, {pipeline_mode = #tpu.pipeline_mode<synchronous>, transform_indices = @transform_8, window_bounds = array<i64: 1, 128>}, {pipeline_mode = #tpu.pipeline_mode<synchronous>, transform_indices = @transform_9, window_bounds = array<i64: 128, 128>}, {pipeline_mode = #tpu.pipeline_mode<synchronous>, transform_indices = @transform_10, window_bounds = array<i64: 1, 128>}, {pipeline_mode = #tpu.pipeline_mode<synchronous>, transform_indices = @transform_11, window_bounds = array<i64: 128, 128>}, {pipeline_mode = #tpu.pipeline_mode<synchronous>, transform_indices = @transform_12, window_bounds = array<i64: 1, 128>}, {transform_indices = @transform_13, window_bounds = array<i64: 16, 128>}]} {
    %c0 = arith.constant 0 : index
    %c0_0 = arith.constant 0 : index
    %0 = vector.load %arg1[%c0, %c0_0] : memref<16x32xf32, #tpu.memory_space<vmem>>, vector<16x32xf32>
    %1 = arith.truncf %0 : vector<16x32xf32> to vector<16x32xbf16>
    %c0_1 = arith.constant 0 : index
    %c0_2 = arith.constant 0 : index
    %2 = vector.load %arg5[%c0_1, %c0_2] : memref<32x128xbf16, #tpu.memory_space<vmem>>, vector<32x128xbf16>
    %cst = arith.constant dense<0.000000e+00> : vector<16x128xf32>
    %3 = tpu.matmul %1, %2, %cst {dimension_numbers = #tpu.dot_dimension_numbers<[1], [0], [0], [1], [0, 0, 1, 1], [], []>} : vector<16x32xbf16>, vector<32x128xbf16>, vector<16x128xf32> -> vector<16x128xf32>
    %c0_3 = arith.constant 0 : index
    %c0_4 = arith.constant 0 : index
    %4 = vector.load %arg2[%c0_3, %c0_4] : memref<16x64xf32, #tpu.memory_space<vmem>>, vector<16x64xf32>
    %5 = arith.truncf %4 : vector<16x64xf32> to vector<16x64xbf16>
    %c0_5 = arith.constant 0 : index
    %c0_6 = arith.constant 0 : index
    %6 = vector.load %arg6[%c0_5, %c0_6] : memref<64x128xbf16, #tpu.memory_space<vmem>>, vector<64x128xbf16>
    %cst_7 = arith.constant dense<0.000000e+00> : vector<16x128xf32>
    %7 = tpu.matmul %5, %6, %cst_7 {dimension_numbers = #tpu.dot_dimension_numbers<[1], [0], [0], [1], [0, 0, 1, 1], [], []>} : vector<16x64xbf16>, vector<64x128xbf16>, vector<16x128xf32> -> vector<16x128xf32>
    %8 = arith.addf %3, %7 : vector<16x128xf32>
    %c0_8 = arith.constant 0 : index
    %c0_9 = arith.constant 0 : index
    %9 = vector.load %arg3[%c0_8, %c0_9] : memref<16x32xf32, #tpu.memory_space<vmem>>, vector<16x32xf32>
    %10 = arith.truncf %9 : vector<16x32xf32> to vector<16x32xbf16>
    %c0_10 = arith.constant 0 : index
    %c0_11 = arith.constant 0 : index
    %11 = vector.load %arg7[%c0_10, %c0_11] : memref<32x128xbf16, #tpu.memory_space<vmem>>, vector<32x128xbf16>
    %cst_12 = arith.constant dense<0.000000e+00> : vector<16x128xf32>
    %12 = tpu.matmul %10, %11, %cst_12 {dimension_numbers = #tpu.dot_dimension_numbers<[1], [0], [0], [1], [0, 0, 1, 1], [], []>} : vector<16x32xbf16>, vector<32x128xbf16>, vector<16x128xf32> -> vector<16x128xf32>
    %13 = arith.addf %8, %12 : vector<16x128xf32>
    %c0_13 = arith.constant 0 : index
    %c0_14 = arith.constant 0 : index
    %14 = vector.load %arg4[%c0_13, %c0_14] : memref<16x48xf32, #tpu.memory_space<vmem>>, vector<16x48xf32>
    %15 = arith.truncf %14 : vector<16x48xf32> to vector<16x48xbf16>
    %c0_15 = arith.constant 0 : index
    %c0_16 = arith.constant 0 : index
    %16 = vector.load %arg8[%c0_15, %c0_16] : memref<48x128xbf16, #tpu.memory_space<vmem>>, vector<48x128xbf16>
    %cst_17 = arith.constant dense<0.000000e+00> : vector<16x128xf32>
    %17 = tpu.matmul %15, %16, %cst_17 {dimension_numbers = #tpu.dot_dimension_numbers<[1], [0], [0], [1], [0, 0, 1, 1], [], []>} : vector<16x48xbf16>, vector<48x128xbf16>, vector<16x128xf32> -> vector<16x128xf32>
    %18 = arith.addf %13, %17 : vector<16x128xf32>
    %c0_18 = arith.constant 0 : index
    %c0_19 = arith.constant 0 : index
    %19 = vector.load %arg9[%c0_18, %c0_19] : memref<1x128xf32, #tpu.memory_space<vmem>>, vector<1x128xf32>
    %20 = vector.broadcast %19 : vector<1x128xf32> to vector<16x128xf32>
    %21 = arith.addf %18, %20 : vector<16x128xf32>
    %cst_20 = arith.constant 0.000000e+00 : f32
    %22 = vector.broadcast %cst_20 : f32 to vector<16x128xf32>
    %23 = arith.maximumf %21, %22 : vector<16x128xf32>
    %c0_21 = arith.constant 0 : index
    %c0_22 = arith.constant 0 : index
    %24 = vector.load %arg10[%c0_21, %c0_22] : memref<128x128xf32, #tpu.memory_space<vmem>>, vector<128x128xf32>
    %c0_23 = arith.constant 0 : index
    %c0_24 = arith.constant 0 : index
    %25 = vector.load %arg11[%c0_23, %c0_24] : memref<1x128xf32, #tpu.memory_space<vmem>>, vector<1x128xf32>
    %cst_25 = arith.constant dense<0.000000e+00> : vector<16x128xf32>
    %26 = tpu.matmul %23, %24, %cst_25 {dimension_numbers = #tpu.dot_dimension_numbers<[1], [0], [0], [1], [0, 0, 1, 1], [], []>} : vector<16x128xf32>, vector<128x128xf32>, vector<16x128xf32> -> vector<16x128xf32>
    %27 = vector.broadcast %25 : vector<1x128xf32> to vector<16x128xf32>
    %28 = arith.mulf %26, %27 : vector<16x128xf32>
    %29 = arith.subf %23, %28 : vector<16x128xf32>
    %30 = arith.mulf %29, %29 : vector<16x128xf32>
    %cst_26 = arith.constant dense<0.000000e+00> : vector<16x128xf32>
    %31 = tpu.matmul %30, %24, %cst_26 {dimension_numbers = #tpu.dot_dimension_numbers<[1], [0], [0], [1], [0, 0, 1, 1], [], []>} : vector<16x128xf32>, vector<128x128xf32>, vector<16x128xf32> -> vector<16x128xf32>
    %32 = vector.broadcast %25 : vector<1x128xf32> to vector<16x128xf32>
    %33 = arith.mulf %31, %32 : vector<16x128xf32>
    %cst_27 = arith.constant 9.99999996E-13 : f32
    %34 = vector.broadcast %cst_27 : f32 to vector<16x128xf32>
    %35 = arith.addf %33, %34 : vector<16x128xf32>
    %36 = math.rsqrt %35 : vector<16x128xf32>
    %37 = arith.mulf %29, %36 : vector<16x128xf32>
    %38 = arith.truncf %37 : vector<16x128xf32> to vector<16x128xbf16>
    %c0_28 = arith.constant 0 : index
    %c0_29 = arith.constant 0 : index
    %39 = vector.load %arg12[%c0_28, %c0_29] : memref<128x128xbf16, #tpu.memory_space<vmem>>, vector<128x128xbf16>
    %cst_30 = arith.constant dense<0.000000e+00> : vector<16x128xf32>
    %40 = tpu.matmul %38, %39, %cst_30 {dimension_numbers = #tpu.dot_dimension_numbers<[1], [0], [0], [1], [0, 0, 1, 1], [], []>} : vector<16x128xbf16>, vector<128x128xbf16>, vector<16x128xf32> -> vector<16x128xf32>
    %c0_31 = arith.constant 0 : index
    %c0_32 = arith.constant 0 : index
    %41 = vector.load %arg13[%c0_31, %c0_32] : memref<1x128xf32, #tpu.memory_space<vmem>>, vector<1x128xf32>
    %42 = vector.broadcast %41 : vector<1x128xf32> to vector<16x128xf32>
    %43 = arith.addf %40, %42 : vector<16x128xf32>
    %44 = arith.truncf %43 : vector<16x128xf32> to vector<16x128xbf16>
    %c0_33 = arith.constant 0 : index
    %c0_34 = arith.constant 0 : index
    %45 = vector.load %arg14[%c0_33, %c0_34] : memref<16x128xbf16, #tpu.memory_space<vmem>>, vector<16x128xbf16>
    tpu.vector_store %arg14[%c0_33, %c0_34], %44 {strides = array<i32>} : memref<16x128xbf16, #tpu.memory_space<vmem>>, vector<16x128xbf16>,
    return
  }
  func.func @transform_0(%arg0: i32) -> (i32, i32) {
    %c0_i32 = arith.constant 0 : i32
    %c0_i32_0 = arith.constant 0 : i32
    return %arg0, %c0_i32 : i32, i32
  }
  func.func @transform_1(%arg0: i32) -> (i32, i32) {
    %c0_i32 = arith.constant 0 : i32
    %c0_i32_0 = arith.constant 0 : i32
    return %arg0, %c0_i32 : i32, i32
  }
  func.func @transform_2(%arg0: i32) -> (i32, i32) {
    %c0_i32 = arith.constant 0 : i32
    %c0_i32_0 = arith.constant 0 : i32
    return %arg0, %c0_i32 : i32, i32
  }
  func.func @transform_3(%arg0: i32) -> (i32, i32) {
    %c0_i32 = arith.constant 0 : i32
    %c0_i32_0 = arith.constant 0 : i32
    return %arg0, %c0_i32 : i32, i32
  }
  func.func @transform_4(%arg0: i32) -> (i32, i32) {
    %c0_i32 = arith.constant 0 : i32
    %c0_i32_0 = arith.constant 0 : i32
    %c0_i32_1 = arith.constant 0 : i32
    return %c0_i32, %c0_i32_0 : i32, i32
  }
  func.func @transform_5(%arg0: i32) -> (i32, i32) {
    %c0_i32 = arith.constant 0 : i32
    %c0_i32_0 = arith.constant 0 : i32
    %c0_i32_1 = arith.constant 0 : i32
    return %c0_i32, %c0_i32_0 : i32, i32
  }
  func.func @transform_6(%arg0: i32) -> (i32, i32) {
    %c0_i32 = arith.constant 0 : i32
    %c0_i32_0 = arith.constant 0 : i32
    %c0_i32_1 = arith.constant 0 : i32
    return %c0_i32, %c0_i32_0 : i32, i32
  }
  func.func @transform_7(%arg0: i32) -> (i32, i32) {
    %c0_i32 = arith.constant 0 : i32
    %c0_i32_0 = arith.constant 0 : i32
    %c0_i32_1 = arith.constant 0 : i32
    return %c0_i32, %c0_i32_0 : i32, i32
  }
  func.func @transform_8(%arg0: i32) -> (i32, i32) {
    %c0_i32 = arith.constant 0 : i32
    %c0_i32_0 = arith.constant 0 : i32
    %c0_i32_1 = arith.constant 0 : i32
    return %c0_i32, %c0_i32_0 : i32, i32
  }
  func.func @transform_9(%arg0: i32) -> (i32, i32) {
    %c0_i32 = arith.constant 0 : i32
    %c0_i32_0 = arith.constant 0 : i32
    %c0_i32_1 = arith.constant 0 : i32
    return %c0_i32, %c0_i32_0 : i32, i32
  }
  func.func @transform_10(%arg0: i32) -> (i32, i32) {
    %c0_i32 = arith.constant 0 : i32
    %c0_i32_0 = arith.constant 0 : i32
    %c0_i32_1 = arith.constant 0 : i32
    return %c0_i32, %c0_i32_0 : i32, i32
  }
  func.func @transform_11(%arg0: i32) -> (i32, i32) {
    %c0_i32 = arith.constant 0 : i32
    %c0_i32_0 = arith.constant 0 : i32
    %c0_i32_1 = arith.constant 0 : i32
    return %c0_i32, %c0_i32_0 : i32, i32
  }
  func.func @transform_12(%arg0: i32) -> (i32, i32) {
    %c0_i32 = arith.constant 0 : i32
    %c0_i32_0 = arith.constant 0 : i32
    %c0_i32_1 = arith.constant 0 : i32
    return %c0_i32, %c0_i32_0 : i32, i32
  }
  func.func @transform_13(%arg0: i32) -> (i32, i32) {
    %c0_i32 = arith.constant 0 : i32
    %c0_i32_0 = arith.constant 0 : i32
    return %arg0, %c0_i32 : i32, i32
  }
}

</mosaic_0001>

<bundles_post_ra>
// kernel: tpu_custom_call.1
= control target key start
LH: loop header
LB: loop body
LE: loop exit
PB: predicated region body
PF: predicated region fallthrough
CT: control target
= control target key end

     0   :  { %18 = vsyncpa [#allocation3], 0  ;;  %s1664_s0 = inlined_call_operand.hbm [shape: f32[16,32], index: 0, kind: input, shape index: {}]   ;;  %s1665_s1 = inlined_call_operand.hbm [shape: f32[16,64], index: 1, kind: input, shape index: {}]   ;;  %s1666_s2 = inlined_call_operand.hbm [shape: f32[16,32], index: 2, kind: input, shape index: {}]   ;;  %s1667_s3 = inlined_call_operand.hbm [shape: f32[16,48], index: 3, kind: input, shape index: {}]   ;;  %s1668_s4 = inlined_call_operand.hbm [shape: bf16[32,128], index: 4, kind: input, shape index: {}]   ;;  %s1669_s5 = inlined_call_operand.hbm [shape: bf16[64,128], index: 5, kind: input, shape index: {}]   ;;  %s1670_s6 = inlined_call_operand.hbm [shape: bf16[32,128], index: 6, kind: input, shape index: {}]   ;;  %s1671_s7 = inlined_call_operand.vmem [shape: bf16[48,128], index: 7, kind: input, shape index: {}]   ;;  %s1672_s8 = inlined_call_operand.vmem [shape: f32[1,128], index: 8, kind: input, shape index: {}]   ;;  %s1673_s9 = inlined_call_operand.hbm [shape: f32[128,128], index: 9, kind: input, shape index: {}]   ;;  %s1674_s10 = inlined_call_operand.vmem [shape: f32[1,128], index: 10, kind: input, shape index: {}]   ;;  %s1675_s11 = inlined_call_operand.hbm [shape: bf16[128,128], index: 11, kind: input, shape index: {}]   ;;  %s1676_s12 = inlined_call_operand.vmem [shape: f32[1,128], index: 12, kind: input, shape index: {}]   ;;  %s1677_s13 = inlined_call_operand.hbm [shape: bf16[16,128], index: 13, kind: output, shape index: {}]  }
   0x1   :  { %19 = vsyncpa [#allocation6], 0 }
   0x2   :  { %20 = vsyncpa [#allocation9], 0 }
   0x3   :  { %21 = vsyncpa [#allocation12], 0 }
   0x4   :  { %22 = vsyncpa [#allocation15], 0 }
   0x5   :  { %23 = vsyncpa [#allocation4], 0  ;;  %s1351_s25 = smov [#allocation5]   ;;  %s1352_s27 = smov [#allocation8]  }
   0x6   :  { %s41_s26 = sshll.u32 %s1351_s25, 4  ;;  %s65_s28 = sshll.u32 %s1352_s27, 4  ;;  %s42_s26 = int_to_ptr.vmem [resolvable:$true] %s41_s26  ;;  %s1437_s28 = int_to_ptr.vmem [resolvable:$true] %s65_s28 }
   0x7   :  { %s1119_s14 = scalar_lea.hbm %s1665_s1, 256 }
   0x8   :  { %p1120_p0 = scmp.ne.s32.totalorder %s1665_s1, %s1119_s14  ;;  %p1123_p1 = scmp.lt.u32.totalorder %s1119_s14, %s1665_s1 }
   0xa   :  { %p1125_p2 = pnand %p1123_p1, %p1120_p0 }
   0xc   :  { %1128 = shalt.err (!%p1125_p2)
}
   0xd   :  { %s1129_s19 = scalar_lea.vmem %s42_s26, 256  ;;  %p1134_p4 = scmp.lt.s32.totalorder %s42_s26, %s42_s26 }
   0xe   :  { %p1130_p3 = scmp.ne.s32.totalorder %s42_s26, %s1129_s19  ;;  %p1135_p5 = scmp.lt.s32.totalorder %s1129_s19, %s1129_s19 }
  0x10   :  { %p1136_p6 = por %p1135_p5, %p1134_p4 }
  0x12   :  { %p1137_p7 = pnand %p1136_p6, %p1130_p3 }
  0x14   :  { %1140 = shalt.err (!%p1137_p7)
}
  0x15   :  { %s1353_s20 = smov 128   ;;  %s1354_s21 = smov 8  }
  0x16   :  { %47 = dma.hbm_to_vmem [thread:$0]  %s1665_s1, 256, %s42_s26, [#allocation6], %s1353_s20, %s1353_s20, %s1354_s21  }
  0x17   :  { %s1141_s27 = scalar_lea.hbm %s1667_s3, 256 }
  0x18   :  { %p1142_p8 = scmp.ne.s32.totalorder %s1667_s3, %s1141_s27  ;;  %p1145_p9 = scmp.lt.u32.totalorder %s1141_s27, %s1667_s3 }
  0x1a   :  { %p1147_p10 = pnand %p1145_p9, %p1142_p8 }
  0x1c   :  { %1150 = shalt.err (!%p1147_p10)
}
  0x1d   :  { %s1151_s16 = scalar_lea.vmem %s1437_s28, 256  ;;  %p1156_p12 = scmp.lt.s32.totalorder %s1437_s28, %s1437_s28 }
  0x1e   :  { %p1152_p11 = scmp.ne.s32.totalorder %s1437_s28, %s1151_s16  ;;  %p1157_p13 = scmp.lt.s32.totalorder %s1151_s16, %s1151_s16 }
  0x20   :  { %p1158_p0 = por %p1157_p13, %p1156_p12 }
  0x22   :  { %p1159_p1 = pnand %p1158_p0, %p1152_p11 }
  0x24   :  { %1162 = shalt.err (!%p1159_p1)
}
  0x25   :  { %71 = dma.hbm_to_vmem [thread:$0]  %s1667_s3, 256, %s1437_s28, [#allocation9], %s1353_s20, %s1353_s20, %s1354_s21  }
  0x26   :  { %s1355_s17 = smov [#allocation11]   ;;  %s1356_s19 = smov [#allocation14]  }
  0x27   :  { %s89_s18 = sshll.u32 %s1355_s17, 4  ;;  %s117_s22 = sshll.u32 %s1356_s19, 4  ;;  %s90_s18 = int_to_ptr.vmem [resolvable:$true] %s89_s18  ;;  %s1474_s22 = int_to_ptr.vmem [resolvable:$true] %s117_s22 }
  0x28   :  { %s1163_s25 = scalar_lea.hbm %s1669_s5, 512 }
  0x29   :  { %p1164_p2 = scmp.ne.s32.totalorder %s1669_s5, %s1163_s25  ;;  %p1167_p3 = scmp.lt.u32.totalorder %s1163_s25, %s1669_s5 }
  0x2b   :  { %p1169_p4 = pnand %p1167_p3, %p1164_p2 }
  0x2d   :  { %1172 = shalt.err (!%p1169_p4)
}
  0x2e   :  { %s1173_s3 = scalar_lea.vmem %s90_s18, 512  ;;  %p1178_p6 = scmp.lt.s32.totalorder %s90_s18, %s90_s18 }
  0x2f   :  { %p1174_p5 = scmp.ne.s32.totalorder %s90_s18, %s1173_s3  ;;  %p1179_p7 = scmp.lt.s32.totalorder %s1173_s3, %s1173_s3 }
  0x31   :  { %p1180_p8 = por %p1179_p7, %p1178_p6 }
  0x33   :  { %p1181_p9 = pnand %p1180_p8, %p1174_p5 }
  0x35   :  { %1184 = shalt.err (!%p1181_p9)
}
  0x36   :  { %s1357_s28 = smov 64   ;;  %s1358_s15 = smov 4  }
  0x37   :  { %95 = dma.hbm_to_vmem [thread:$0]  %s1669_s5, 512, %s90_s18, [#allocation12], %s1357_s28, %s1357_s28, %s1358_s15  }
  0x38   :  { %s1185_s19 = scalar_lea.hbm %s1673_s9, 2048 }
  0x39   :  { %p1186_p10 = scmp.ne.s32.totalorder %s1673_s9, %s1185_s19  ;;  %p1189_p11 = scmp.lt.u32.totalorder %s1185_s19, %s1673_s9 }
  0x3b   :  { %p1191_p12 = pnand %p1189_p11, %p1186_p10 }
  0x3d   :  { %1194 = shalt.err (!%p1191_p12)
}
  0x3e   :  { %s1195_s29 = scalar_lea.vmem %s1474_s22, 2048  ;;  %p1200_p0 = scmp.lt.s32.totalorder %s1474_s22, %s1474_s22 }
  0x3f   :  { %p1196_p13 = scmp.ne.s32.totalorder %s1474_s22, %s1195_s29  ;;  %p1201_p1 = scmp.lt.s32.totalorder %s1195_s29, %s1195_s29 }
  0x41   :  { %p1202_p2 = por %p1201_p1, %p1200_p0 }
  0x43   :  { %p1203_p3 = pnand %p1202_p2, %p1196_p13 }
  0x45   :  { %1206 = shalt.err (!%p1203_p3)
}
  0x46   :  { %123 = dma.hbm_to_vmem [thread:$0]  %s1673_s9, 2048, %s1474_s22, [#allocation15], %s1353_s20, %s1353_s20, %s1354_s21  }
  0x47   :  { %s1359_s30 = smov [#allocation2]   ;;  %s1360_s3 = smov [#allocation7]  }
  0x48   :  { %s29_s14 = sshll.u32 %s1359_s30, 4  ;;  %s53_s16 = sshll.u32 %s1360_s3, 4  ;;  %s30_s14 = int_to_ptr.vmem [resolvable:$true] %s29_s14  ;;  %s1511_s16 = int_to_ptr.vmem [resolvable:$true] %s53_s16 }
  0x49   :  { %s1207_s17 = scalar_lea.hbm %s1664_s0, 256 }
  0x4a   :  { %p1208_p4 = scmp.ne.s32.totalorder %s1664_s0, %s1207_s17  ;;  %p1211_p5 = scmp.lt.u32.totalorder %s1207_s17, %s1664_s0 }
  0x4c   :  { %p1213_p6 = pnand %p1211_p5, %p1208_p4 }
  0x4e   :  { %1216 = shalt.err (!%p1213_p6)
}
  0x4f   :  { %s1217_s9 = scalar_lea.vmem %s30_s14, 256  ;;  %p1222_p8 = scmp.lt.s32.totalorder %s30_s14, %s30_s14 }
  0x50   :  { %p1218_p7 = scmp.ne.s32.totalorder %s30_s14, %s1217_s9  ;;  %p1223_p9 = scmp.lt.s32.totalorder %s1217_s9, %s1217_s9 }
  0x52   :  { %p1224_p10 = por %p1223_p9, %p1222_p8 }
  0x54   :  { %p1225_p11 = pnand %p1224_p10, %p1218_p7 }
  0x56   :  { %1228 = shalt.err (!%p1225_p11)
}
  0x57   :  { %35 = dma.hbm_to_vmem [thread:$0]  %s1664_s0, 256, %s30_s14, [#allocation3], %s1353_s20, %s1353_s20, %s1354_s21  }
  0x58   :  { %s1229_s18 = scalar_lea.hbm %s1666_s2, 256 }
  0x59   :  { %p1230_p12 = scmp.ne.s32.totalorder %s1666_s2, %s1229_s18  ;;  %p1233_p13 = scmp.lt.u32.totalorder %s1229_s18, %s1666_s2 }
  0x5b   :  { %p1235_p0 = pnand %p1233_p13, %p1230_p12 }
  0x5d   :  { %1238 = shalt.err (!%p1235_p0)
}
  0x5e   :  { %s1239_s17 = scalar_lea.vmem %s1511_s16, 256  ;;  %p1244_p2 = scmp.lt.s32.totalorder %s1511_s16, %s1511_s16 }
  0x5f   :  { %p1240_p1 = scmp.ne.s32.totalorder %s1511_s16, %s1239_s17  ;;  %p1245_p3 = scmp.lt.s32.totalorder %s1239_s17, %s1239_s17 }
  0x61   :  { %p1246_p4 = por %p1245_p3, %p1244_p2 }
  0x63   :  { %p1247_p5 = pnand %p1246_p4, %p1240_p1 }
  0x65   :  { %1250 = shalt.err (!%p1247_p5)
}
  0x66   :  { %59 = dma.hbm_to_vmem [thread:$0]  %s1666_s2, 256, %s1511_s16, [#allocation6], %s1353_s20, %s1353_s20, %s1354_s21  }
  0x67   :  { %s1361_s19 = smov [#allocation10]   ;;  %s1362_s24 = smov [#allocation13]  }
  0x68   :  { %s77_s23 = sshll.u32 %s1361_s19, 4  ;;  %s101_s25 = sshll.u32 %s1362_s24, 4  ;;  %s78_s23 = int_to_ptr.vmem [resolvable:$true] %s77_s23  ;;  %s1548_s25 = int_to_ptr.vmem [resolvable:$true] %s101_s25 }
  0x69   :  { %s1251_s27 = scalar_lea.hbm %s1668_s4, 256 }
  0x6a   :  { %p1252_p6 = scmp.ne.s32.totalorder %s1668_s4, %s1251_s27  ;;  %p1255_p7 = scmp.lt.u32.totalorder %s1251_s27, %s1668_s4 }
  0x6c   :  { %p1257_p8 = pnand %p1255_p7, %p1252_p6 }
  0x6e   :  { %1260 = shalt.err (!%p1257_p8)
}
  0x6f   :  { %s1261_s2 = scalar_lea.vmem %s78_s23, 256  ;;  %p1266_p10 = scmp.lt.s32.totalorder %s78_s23, %s78_s23 }
  0x70   :  { %p1262_p9 = scmp.ne.s32.totalorder %s78_s23, %s1261_s2  ;;  %p1267_p11 = scmp.lt.s32.totalorder %s1261_s2, %s1261_s2 }
  0x72   :  { %p1268_p12 = por %p1267_p11, %p1266_p10 }
  0x74   :  { %p1269_p13 = pnand %p1268_p12, %p1262_p9 }
  0x76   :  { %1272 = shalt.err (!%p1269_p13)
}
  0x77   :  { %83 = dma.hbm_to_vmem [thread:$0]  %s1668_s4, 256, %s78_s23, [#allocation9], %s1357_s28, %s1357_s28, %s1358_s15  }
  0x78   :  { %s1273_s1 = scalar_lea.hbm %s1670_s6, 256 }
  0x79   :  { %p1274_p0 = scmp.ne.s32.totalorder %s1670_s6, %s1273_s1  ;;  %p1277_p1 = scmp.lt.u32.totalorder %s1273_s1, %s1670_s6 }
  0x7b   :  { %p1279_p2 = pnand %p1277_p1, %p1274_p0 }
  0x7d   :  { %1282 = shalt.err (!%p1279_p2)
}
  0x7e   :  { %s1283_s19 = scalar_lea.vmem %s1548_s25, 256  ;;  %p1288_p4 = scmp.lt.s32.totalorder %s1548_s25, %s1548_s25 }
  0x7f   :  { %p1284_p3 = scmp.ne.s32.totalorder %s1548_s25, %s1283_s19  ;;  %p1289_p5 = scmp.lt.s32.totalorder %s1283_s19, %s1283_s19 }
  0x81   :  { %p1290_p6 = por %p1289_p5, %p1288_p4 }
  0x83   :  { %p1291_p7 = pnand %p1290_p6, %p1284_p3 }
  0x85   :  { %1294 = shalt.err (!%p1291_p7)
}
  0x86   :  { %107 = dma.hbm_to_vmem [thread:$0]  %s1670_s6, 256, %s1548_s25, [#allocation12], %s1357_s28, %s1357_s28, %s1358_s15  }
  0x87   :  { %s1363_s24 = smov [#allocation16]   ;;  %s1295_s29 = scalar_lea.hbm %s1675_s11, 1024 }
  0x88   :  { %s131_s9 = sshll.u32 %s1363_s24, 4  ;;  %p1296_p8 = scmp.ne.s32.totalorder %s1675_s11, %s1295_s29  ;;  %s132_s9 = int_to_ptr.vmem [resolvable:$true] %s131_s9 }
  0x89   :  { %p1299_p9 = scmp.lt.u32.totalorder %s1295_s29, %s1675_s11 }
  0x8b   :  { %p1301_p10 = pnand %p1299_p9, %p1296_p8 }
  0x8d   :  { %1304 = shalt.err (!%p1301_p10)
}
  0x8e   :  { %s1305_s20 = scalar_lea.vmem %s132_s9, 1024  ;;  %p1310_p12 = scmp.lt.s32.totalorder %s132_s9, %s132_s9 }
  0x8f   :  { %p1306_p11 = scmp.ne.s32.totalorder %s132_s9, %s1305_s20  ;;  %p1311_p13 = scmp.lt.s32.totalorder %s1305_s20, %s1305_s20 }
  0x91   :  { %p1312_p0 = por %p1311_p13, %p1310_p12 }
  0x93   :  { %p1313_p1 = pnand %p1312_p0, %p1306_p11 }
  0x95   :  { %1316 = shalt.err (!%p1313_p1)
}
  0x96   :  { %137 = dma.hbm_to_vmem [thread:$0]  %s1675_s11, 1024, %s132_s9, [#allocation15], %s1357_s28, %s1357_s28, %s1358_s15  }
  0x97   :  { %1339 = dma.done.wait [#allocation3], 256  }
  0x98   :  { %1340 = vsyncadd [#allocation3], 4294967040 }
  0x99   :  { %1341 = dma.done.wait [#allocation6], 512  }
  0x9a   :  { %1342 = vsyncadd [#allocation6], 4294966784 }
  0x9b   :  { %1343 = dma.done.wait [#allocation9], 512  }
  0x9c   :  { %1344 = vsyncadd [#allocation9], 4294966784 }
  0x9d   :  { %1345 = dma.done.wait [#allocation12], 768  }
  0x9e   :  { %1346 = vsyncadd [#allocation12], 4294966528 }
  0x9f   :  { %1347 = dma.done.wait [#allocation15], 3072  }
  0xa0   :  { %1348 = vsyncadd [#allocation15], 4294964224  ;;  %v1364_v0 = vmov 0.0   ;;  %vm1365_vm0 = vmmov 0   ;;  %v1096_v1 = vld [vmem:[#allocation11] sm:$0xff]   ;;  %v1097_v2 = vld [vmem:[#allocation11 + $0x8] sm:$0xff]  }
  0xa1   :  { %888 = vmatprep.subr.bf16.mxu0 %v1364_v0  ;;  %896 = vmatprep.mubr.msk.bf16.mxu0 %vm1365_vm0, %v1364_v0  ;;  %v1098_v3 = vld [vmem:[#allocation11 + $0x10] sm:$0xff]   ;;  %v1101_v4 = vld [vmem:[#allocation13] sm:$0xff]   ;;  %v1099_v5 = vld [vmem:[#allocation11 + $0x18] sm:$0xff]   ;;  %vm210_vm1 = vcmask 523264   ;;  %vm267_vm2 = vcmask 261120   ;;  %vm404_vm3 = vcmask 392192  }
  0xa2   :  { %908 = vmatprep.subr.bf16.mxu1 %v1364_v0  ;;  %912 = vmatprep.mubr.msk.bf16.mxu1 %vm1365_vm0, %v1364_v0  ;;  %v1103_v6 = vld [vmem:[#allocation13 + $0x8] sm:$0xff]   ;;  %v175_v7 = vld [vmem:[#allocation5] sm:$0xff]  ;;  %v312_v9 = vld [vmem:[#allocation7] sm:$0xff]  ;;  %s1366_s19 = smov [#allocation17]  }
  0xa3   :  { %889 = vmatpush3.bf16.msra.mxu0 %v1096_v1  ;;  %909 = vmatpush3.bf16.msra.mxu1 %v1101_v4  ;;  %v176_v8 = vld [vmem:[#allocation5 + $0x8] sm:$0xff]  ;;  %v313_v10 = vld [vmem:[#allocation7 + $0x8] sm:$0xff]  ;;  %v1100_v13 = vld [vmem:[#allocation10] sm:$0xff]   ;;  %s777_s4 = sshll.u32 %s1366_s19, 4  ;;  %s778_s4 = int_to_ptr.vmem [resolvable:$true] %s777_s4 }
  0xa4   :  { %890 = vmatprep.subr.bf16.mxu0 %v1364_v0  ;;  %910 = vmatprep.subr.bf16.mxu1 %v1364_v0  ;;  %v314_v11 = vpack.c.bf16 %v313_v10, %v312_v9  ;;  %v177_v12 = vpack.c.bf16 %v176_v8, %v175_v7  ;;  %v462_v14 = vld [vmem:[#allocation14] sm:$0xff]  ;;  %v463_v15 = vld [vmem:[#allocation14 + $0x8] sm:$0xff]  ;;  %v1105_v22 = vld [vmem:[%s1671_s7 + $0x8] sm:$0xff]   ;;  %s1317_s23 = scalar_lea.vmem %s778_s4, 128  ;;  %p1322_p3 = scmp.lt.s32.totalorder %s778_s4, %s778_s4 }
  0xa5   :  { %v1016_v16 = vpack.c.bf16 %v463_v15, %v462_v14  ;;  %v1102_v17 = vld [vmem:[#allocation10 + $0x8] sm:$0xff]   ;;  %v168_v18 = vld [vmem:[#allocation2] sm:$0xff]  ;;  %v1106_v23 = vld [vmem:[%s1671_s7 + $0x10] sm:$0xff]   ;;  %p1318_p2 = scmp.ne.s32.totalorder %s778_s4, %s1317_s23  ;;  %p1323_p4 = scmp.lt.s32.totalorder %s1317_s23, %s1317_s23 }
  0xa6   :  { %v169_v19 = vld [vmem:[#allocation2 + $0x8] sm:$0xff]  ;;  %v377_v24 = vld [vmem:[#allocation8] sm:$0xff]  ;;  %v378_v25 = vld [vmem:[#allocation8 + $0x8] sm:$0xff] }
  0xa7   :  { %891 = vmatpush3.bf16.msra.mxu0 %v1097_v2  ;;  %911 = vmatpush3.bf16.msra.mxu1 %v1103_v6  ;;  %v170_v20 = vpack.c.bf16 %v169_v19, %v168_v18  ;;  %v1104_v21 = vld [vmem:[%s1671_s7] sm:$0xff]   ;;  %v379_v26 = vpack.c.bf16 %v378_v25, %v377_v24  ;;  %v464_v27 = vld [vmem:[#allocation14 + $0x10] sm:$0xff]  ;;  %v465_v28 = vld [vmem:[#allocation14 + $0x18] sm:$0xff]  ;;  %p1324_p5 = por %p1323_p4, %p1322_p3 }
  0xa8   :  { %892 = vmatprep.subr.bf16.mxu0 %v1364_v0  ;;  %1017 = vmatprep.subr.bf16.mxu1 %v1016_v16  ;;  %v1020_v29 = vpack.c.bf16 %v465_v28, %v464_v27  ;;  %v466_v30 = vld [vmem:[#allocation14 + $0x20] sm:$0xff]  ;;  %v467_v31 = vld [vmem:[#allocation14 + $0x28] sm:$0xff]  ;;  %v468_v33 = vld [vmem:[#allocation14 + $0x30] sm:$0xff] }
  0xa9   :  { %v1024_v32 = vpack.c.bf16 %v467_v31, %v466_v30  ;;  %v469_v34 = vld [vmem:[#allocation14 + $0x38] sm:$0xff]  ;;  %v470_v36 = vld [vmem:[#allocation14 + $0x40] sm:$0xff]  ;;  %v471_v37 = vld [vmem:[#allocation14 + $0x48] sm:$0xff]  ;;  %p1325_p6 = pnand %p1324_p5, %p1318_p2 }
  0xaa   :  { %913 = vmatmul.mubr.msk.bf16.vlgmr.msra.gmra.mrb[0].mxu1 %vm267_vm2, %v314_v11  ;;  %v1028_v35 = vpack.c.bf16 %v469_v34, %v468_v33  ;;  %v1032_v38 = vpack.c.bf16 %v471_v37, %v470_v36  ;;  %v472_v39 = vld [vmem:[#allocation14 + $0x50] sm:$0xff]  ;;  %v473_v40 = vld [vmem:[#allocation14 + $0x58] sm:$0xff]  ;;  %v474_v42 = vld [vmem:[#allocation14 + $0x60] sm:$0xff] }
  0xab   :  { %893 = vmatpush3.bf16.msra.mxu0 %v1098_v3  ;;  %1019 = vmatpush3.bf16.msra.mxu1 %v1016_v16  ;;  %v1036_v41 = vpack.c.bf16 %v473_v40, %v472_v39  ;;  %v475_v43 = vld [vmem:[#allocation14 + $0x68] sm:$0xff]  ;;  %v476_v45 = vld [vmem:[#allocation14 + $0x70] sm:$0xff]  ;;  %v477_v46 = vld [vmem:[#allocation14 + $0x78] sm:$0xff] }
  0xac   :  { %894 = vmatprep.subr.bf16.mxu0 %v1364_v0  ;;  %1021 = vmatprep.subr.bf16.mxu1 %v1020_v29  ;;  %v1040_v44 = vpack.c.bf16 %v475_v43, %v474_v42  ;;  %v1044_v47 = vpack.c.bf16 %v477_v46, %v476_v45  ;;  %v808_v2 = vld [vmem:[%s1672_s8] ss:$0 sm:$0xff]  ;;  %v1109_v14 = vld [vmem:[#allocation16 + $0x10] sm:$0xff]   ;;  %v1110_v24 = vld [vmem:[#allocation16 + $0x18] sm:$0xff]  }
  0xad   :  { %v809_v15 = vld [vmem:[%s1674_s10] ss:$0 sm:$0xff]  ;;  %v1111_v25 = vld [vmem:[#allocation16 + $0x20] sm:$0xff]   ;;  %v1113_v27 = vld [vmem:[#allocation16 + $0x30] sm:$0xff]  }
  0xae   :  { %v1114_v28 = vld [vmem:[#allocation16 + $0x38] sm:$0xff]   ;;  %v810_v40 = vld [vmem:[%s1676_s12] ss:$0 sm:$0xff] }
  0xaf   :  { %895 = vmatpush3.bf16.msra.mxu0 %v1099_v5  ;;  %1023 = vmatpush3.bf16.msra.mxu1 %v1020_v29 }
  0xb0   :  { %900 = vmatprep.subr.bf16.mxu0 %v1364_v0  ;;  %1025 = vmatprep.subr.bf16.mxu1 %v1024_v32 }
  0xb2   :  { %897 = vmatmul.mubr.msk.bf16.vlgmr.msra.gmra.mrb[0].mxu0 %vm210_vm1, %v177_v12  ;;  %v1107_v12 = vld [vmem:[#allocation16] sm:$0xff]  }
  0xb3   :  { %901 = vmatpush3.bf16.msra.mxu0 %v1100_v13  ;;  %904 = vmatprep.mubr.msk.bf16.mxu0 %vm1365_vm0, %v1364_v0  ;;  %v1108_v13 = vld [vmem:[#allocation16 + $0x8] sm:$0xff]  }
  0xb4   :  { %902 = vmatprep.subr.bf16.mxu0 %v1364_v0  ;;  %1027 = vmatpush3.bf16.msra.mxu1 %v1024_v32 }
  0xb5   :  { %1029 = vmatprep.subr.bf16.mxu1 %v1028_v35 }
  0xb7   :  { %903 = vmatpush3.bf16.msra.mxu0 %v1102_v17 }
  0xb8   :  { %916 = vmatprep.subr.bf16.mxu0 %v1364_v0  ;;  %1031 = vmatpush3.bf16.msra.mxu1 %v1028_v35 }
  0xb9   :  { %1033 = vmatprep.subr.bf16.mxu1 %v1032_v38 }
  0xba   :  { %905 = vmatmul.mubr.msk.bf16.vlgmr.msra.gmra.mrb[4].mxu0 %vm267_vm2, %v170_v20 }
  0xbb   :  { %917 = vmatpush3.bf16.msra.mxu0 %v1104_v21  ;;  %922 = vmatprep.mubr.msk.bf16.mxu0 %vm1365_vm0, %v1364_v0 }
  0xbc   :  { %918 = vmatprep.subr.bf16.mxu0 %v1364_v0  ;;  %1035 = vmatpush3.bf16.msra.mxu1 %v1032_v38 }
  0xbd   :  { %1037 = vmatprep.subr.bf16.mxu1 %v1036_v41 }
  0xbf   :  { %919 = vmatpush3.bf16.msra.mxu0 %v1105_v22 }
  0xc0   :  { %920 = vmatprep.subr.bf16.mxu0 %v1364_v0  ;;  %1039 = vmatpush3.bf16.msra.mxu1 %v1036_v41 }
  0xc1   :  { %1041 = vmatprep.subr.bf16.mxu1 %v1040_v44 }
  0xc3   :  { %921 = vmatpush3.bf16.msra.mxu0 %v1106_v23 }
  0xc4   :  { %1049 = vmatprep.subr.bf16.mxu0 %v1016_v16  ;;  %1043 = vmatpush3.bf16.msra.mxu1 %v1040_v44 }
  0xc5   :  { %1045 = vmatprep.subr.bf16.mxu1 %v1044_v47 }
  0xc6   :  { %923 = vmatmul.mubr.msk.bf16.vlgmr.msra.gmra.mrb[8].mxu0 %vm404_vm3, %v379_v26  ;;  %v1112_v26 = vld [vmem:[#allocation16 + $0x28] sm:$0xff]  }
  0xc7   :  { %1051 = vmatpush3.bf16.msra.mxu0 %v1016_v16 }
  0xc8   :  { %1053 = vmatprep.subr.bf16.mxu0 %v1020_v29  ;;  %1047 = vmatpush3.bf16.msra.mxu1 %v1044_v47 }
  0xc9   :  { %996 = vmatprep.subr.bf16.mxu1 %v1364_v0 }
  0xcb   :  { %1055 = vmatpush3.bf16.msra.mxu0 %v1020_v29 }
  0xcc   :  { %1057 = vmatprep.subr.bf16.mxu0 %v1024_v32 }
  0xcf   :  { %1059 = vmatpush3.bf16.msra.mxu0 %v1024_v32 }
  0xd0   :  { %1061 = vmatprep.subr.bf16.mxu0 %v1028_v35 }
  0xd3   :  { %1063 = vmatpush3.bf16.msra.mxu0 %v1028_v35 }
  0xd4   :  { %1065 = vmatprep.subr.bf16.mxu0 %v1032_v38 }
  0xd7   :  { %1067 = vmatpush3.bf16.msra.mxu0 %v1032_v38 }
  0xd8   :  { %1069 = vmatprep.subr.bf16.mxu0 %v1036_v41 }
  0xdb   :  { %1071 = vmatpush3.bf16.msra.mxu0 %v1036_v41 }
  0xdc   :  { %1073 = vmatprep.subr.bf16.mxu0 %v1040_v44 }
  0xdf   :  { %1075 = vmatpush3.bf16.msra.mxu0 %v1040_v44 }
  0xe0   :  { %1077 = vmatprep.subr.bf16.mxu0 %v1044_v47 }
  0xe3   :  { %1079 = vmatpush3.bf16.msra.mxu0 %v1044_v47 }
 0x17d   :  { %v368_v48 = vpop.f32.mrb[0].mxu1 }
 0x17e   :  { %v914_v49 = vpop.f32.mrb[1].mxu1 }
 0x17f   :  { %v371_v51 = vpop.f32.mrb[2].mxu1 }
 0x180   :  { %v915_v53 = vpop.f32.mrb[3].mxu1 }
 0x185   :  { %v248_v50 = vpop.f32.mrb[0].mxu0 }
 0x186   :  { %v898_v52 = vpop.f32.mrb[1].mxu0 }
 0x187   :  { %v251_v54 = vpop.f32.mrb[2].mxu0 }
 0x188   :  { %v899_v55 = vpop.f32.mrb[3].mxu0 }
 0x18d   :  { %v305_v56 = vpop.f32.mrb[4].mxu0 }
 0x18e   :  { %v306_v57 = vadd.f32 %v305_v56, %v248_v50  ;;  %v906_v58 = vpop.f32.mrb[5].mxu0 }
 0x18f   :  { %v308_v59 = vpop.f32.mrb[6].mxu0 }
 0x190   :  { %v309_v60 = vadd.f32 %v308_v59, %v251_v54  ;;  %v375_v61 = vadd.f32 %v368_v48, %v306_v57  ;;  %v907_v62 = vpop.f32.mrb[7].mxu0 }
 0x192   :  { %v376_v63 = vadd.f32 %v371_v51, %v309_v60 }
 0x199   :  { %v442_v1 = vpop.f32.mrb[8].mxu0 }
 0x19a   :  { %v449_v3 = vadd.f32 %v442_v1, %v375_v61  ;;  %v924_v4 = vpop.f32.mrb[9].mxu0 }
 0x19b   :  { %v445_v5 = vpop.f32.mrb[10].mxu0 }
 0x19c   :  { %v458_v6 = vadd.f32 %v808_v2, %v449_v3  ;;  %v450_v7 = vadd.f32 %v445_v5, %v376_v63  ;;  %v925_v8 = vpop.f32.mrb[11].mxu0 }
 0x19e   :  { %v460_v9 = vmax.f32 %v458_v6, 0.0  ;;  %v459_v10 = vadd.f32 %v808_v2, %v450_v7 }
 0x1a0   :  { %v461_v11 = vmax.f32 %v459_v10, 0.0  ;;  %958 = vmatprep.mubr.f32.mxu1 %v460_v9 }
 0x1a2   :  { %959 = vmatmul.mubr.f32.vlgmr.msra.gmra.mrb[4].mxu1 %v461_v11 }
 0x1a3   :  { %1012 = vmatprep.mubr.msk.bf16.mxu1 %vm1365_vm0, %v1364_v0  ;;  %997 = vmatpush3.bf16.msra.mxu1 %v1107_v12 }
 0x1a4   :  { %998 = vmatprep.subr.bf16.mxu1 %v1364_v0 }
 0x1a7   :  { %999 = vmatpush3.bf16.msra.mxu1 %v1108_v13 }
 0x1a8   :  { %1000 = vmatprep.subr.bf16.mxu1 %v1364_v0 }
 0x1ab   :  { %1001 = vmatpush3.bf16.msra.mxu1 %v1109_v14 }
 0x1ac   :  { %1002 = vmatprep.subr.bf16.mxu1 %v1364_v0 }
 0x1af   :  { %1003 = vmatpush3.bf16.msra.mxu1 %v1110_v24 }
 0x1b0   :  { %1004 = vmatprep.subr.bf16.mxu1 %v1364_v0 }
 0x1b3   :  { %1005 = vmatpush3.bf16.msra.mxu1 %v1111_v25 }
 0x1b4   :  { %1006 = vmatprep.subr.bf16.mxu1 %v1364_v0 }
 0x1b7   :  { %1007 = vmatpush3.bf16.msra.mxu1 %v1112_v26 }
 0x1b8   :  { %1008 = vmatprep.subr.bf16.mxu1 %v1364_v0 }
 0x1bb   :  { %1009 = vmatpush3.bf16.msra.mxu1 %v1113_v27 }
 0x1bc   :  { %1010 = vmatprep.subr.bf16.mxu1 %v1364_v0 }
 0x1bf   :  { %1011 = vmatpush3.bf16.msra.mxu1 %v1114_v28 }
 0x275   :  { %v960_v16 = vpop.f32.mrb[4].mxu1 }
 0x276   :  { %v561_v17 = vmul.f32 %v960_v16, %v809_v15  ;;  %v545_v18 = vpop.f32.mrb[5].mxu1 }
 0x277   :  { %v560_v19 = vmul.f32 %v809_v15, %v545_v18 }
 0x278   :  { %v563_v20 = vsub.f32 %v461_v11, %v561_v17 }
 0x279   :  { %v562_v21 = vsub.f32 %v460_v9, %v560_v19 }
 0x27a   :  { %v565_v23 = vmul.f32 %v563_v20, %v563_v20 }
 0x27b   :  { %v564_v22 = vmul.f32 %v562_v21, %v562_v21 }
 0x27d   :  { %993 = vmatprep.mubr.f32.mxu0 %v564_v22 }
 0x27e   :  { %994 = vmatmul.mubr.f32.vlgmr.msra.gmra.mrb[12].mxu0 %v565_v23 }
 0x351   :  { %v995_v29 = vpop.f32.mrb[12].mxu0 }
 0x352   :  { %v642_v30 = vmul.f32 %v995_v29, %v809_v15  ;;  %v632_v31 = vpop.f32.mrb[13].mxu0 }
 0x353   :  { %v641_v32 = vmul.f32 %v809_v15, %v632_v31 }
 0x354   :  { %v644_v33 = vadd.f32 1e-12, %v642_v30 }
 0x355   :  { %v643_v34 = vadd.f32 1e-12, %v641_v32 }
 0x356   :  { %1115 = vrsqrt.f32 %v644_v33 }
 0x357   :  { %1117 = vrsqrt.f32 %v643_v34 }
 0x360   :  { %v1116_v35 = vpop.eup %1115 }
 0x361   :  { %v1118_v36 = vpop.eup %1117  ;;  %v648_v37 = vmul.f32 %v1116_v35, %v563_v20 }
 0x362   :  { %v647_v38 = vmul.f32 %v1118_v36, %v562_v21 }
 0x364   :  { %v649_v39 = vpack.c.bf16 %v648_v37, %v647_v38 }
 0x366   :  { %1013 = vmatmul.mubr.bf16.vlgmr.msra.gmra.mrb[8].mxu1 %v649_v39 }
 0x439   :  { %v755_v0 = vpop.f32.mrb[8].mxu1 }
 0x43a   :  { %v1014_v41 = vpop.f32.mrb[9].mxu1  ;;  %v756_v43 = vadd.f32 %v810_v40, %v755_v0 }
 0x43b   :  { %v758_v42 = vpop.f32.mrb[10].mxu1 }
 0x43c   :  { %v759_v44 = vadd.f32 %v810_v40, %v758_v42  ;;  %v1015_v45 = vpop.f32.mrb[11].mxu1 }
 0x43e   :  { %v826_v46 = vpack.c.bf16 %v759_v44, %v756_v43 }
 0x440   :  { %827 = vst [vmem:[#allocation17] sm:$0xff] %v826_v46  }
 0x441   :  { %1328 = shalt.err (!%p1325_p6)
}
 0x442   :  { %s1329_s9 = scalar_lea.hbm %s1677_s13, 128 }
 0x443   :  { %p1330_p7 = scmp.ne.s32.totalorder %s1677_s13, %s1329_s9  ;;  %p1333_p8 = scmp.lt.u32.totalorder %s1329_s9, %s1677_s13 }
 0x445   :  { %p1335_p9 = pnand %p1333_p8, %p1330_p7 }
 0x447   :  { %1338 = shalt.err (!%p1335_p9)
}
 0x448   :  { %783 = dma.vmem_to_hbm [thread:$0]  %s778_s4, 128, %s1677_s13, [#allocation4], %s1357_s28, %s1357_s28, %s1358_s15  }
 0x449   :  { %1349 = dma.done.wait [#allocation4], 128  }
 0x44a   :  { %1350 = vsyncadd [#allocation4], 4294967168 }
 0x44b   :  { %787 = vsyncpa [#allocation3], 1 }
 0x44c   :  { %788 = vsyncpa [#allocation6], 1 }
 0x44d   :  { %789 = vsyncpa [#allocation9], 1 }
 0x44e   :  { %790 = vsyncpa [#allocation12], 1 }
 0x44f   :  { %791 = vsyncpa [#allocation15], 1 }
 0x450   :  { %792 = vsyncpa [#allocation4], 1 }

</bundles_post_ra>
